<compile_context>
chip_gen: v7x
topology: tpu7x:2x2x1
jax: 0.10.0
libtpu: 0.0.40
codegen_flags: <defaults>
</compile_context>

<pallas_src>
import functools

import jax
import jax.numpy as jnp
from jax.experimental import pallas as pl
from jax.experimental.pallas import tpu as pltpu

BN_EPS = 1e-5
LANE = 128


# ---------------------------------------------------------------------------
# Fused forward kernel: everything stays resident in VMEM.
# Zero-padded lanes stay exactly zero through every Linear+BN+ReLU block
# (zero weight cols, zero gamma/beta -> h=0, mean=0, var=0 -> BN output 0 -> ReLU 0),
# so padding never perturbs the real columns' batch statistics or values.
# ---------------------------------------------------------------------------
def _fused_dipvae_kernel(x_ref, eps_ref,
                         inf_w1_ref, inf_p1_ref, inf_wf_ref, inf_pf_ref,
                         inf_ow_ref, inf_ob_ref,
                         gen_w1_ref, gen_p1_ref, gen_wf_ref, gen_pf_ref,
                         gen_ow_ref, gen_ob_ref,
                         recon_ref, mustd_ref,
                         *, n_inf_feat, n_gen_feat, lat_pad):

    def linear(h_f32, w_bf16):
        # bf16 x bf16 on the MXU, f32 accumulation; elementwise math stays f32.
        return jnp.dot(h_f32.astype(jnp.bfloat16), w_bf16,
                       preferred_element_type=jnp.float32)

    def bn_relu(h, p):
        # Train-mode BatchNorm1d (biased variance) + ReLU.  Hidden-layer Linear bias is
        # dropped: train-mode BN cancels it exactly (mean absorbs it, var is shift-inv.).
        gamma, beta = p[0:1, :], p[1:2, :]
        mean = jnp.mean(h, axis=0, keepdims=True)
        meansq = jnp.mean(h * h, axis=0, keepdims=True)
        var = jnp.maximum(meansq - mean * mean, 0.0)
        scale = jax.lax.rsqrt(var + BN_EPS) * gamma      # hoisted per-column scale
        shift = beta - mean * scale
        return jnp.maximum(h * scale + shift, 0.0)       # BN + ReLU

    def fcnet(h, w1_ref, p1_ref, wf_ref, pf_ref, n_feat, ow_ref, ob_ref):
        h = bn_relu(linear(h, w1_ref[...]), p1_ref[...])        # fc1 -> bn1 -> relu
        for l in range(n_feat):                                  # static unroll: features
            h = bn_relu(linear(h, wf_ref[l]), pf_ref[l])
        return linear(h, ow_ref[...]) + ob_ref[...]              # fc_out (bias kept)

    x = x_ref[...]                                               # (B, Din_pad) f32

    # ---- inference net ----
    z = fcnet(x, inf_w1_ref, inf_p1_ref, inf_wf_ref, inf_pf_ref, n_inf_feat,
              inf_ow_ref, inf_ob_ref)                            # (B, 2*L_pad)
    mu = z[:, :lat_pad]                                          # lane-aligned 128-wide slices
    pre = z[:, lat_pad:]
    # softplus with torch's threshold=20 semantics
    std = jnp.where(pre > 20.0, pre, jnp.log1p(jnp.exp(jnp.minimum(pre, 20.0))))
    z_sample = mu + eps_ref[...] * std                           # padded eps lanes are 0

    # packed lane-dense (B, 2*L_pad) output: [mu | std]
    mustd_ref[:, :lat_pad] = mu
    mustd_ref[:, lat_pad:] = std

    # ---- generative net ----
    r = fcnet(z_sample, gen_w1_ref, gen_p1_ref, gen_wf_ref, gen_pf_ref, n_gen_feat,
              gen_ow_ref, gen_ob_ref)
    recon_ref[...] = jax.nn.sigmoid(r)


# ---------------------------------------------------------------------------
# Parameter construction (deterministic, mimics torch.nn.Linear default init)
# ---------------------------------------------------------------------------
def init_linear(key, in_dim, out_dim):
    kw, kb = jax.random.split(key)
    bound = 1.0 / (in_dim ** 0.5)
    w = jax.random.uniform(kw, (in_dim, out_dim), jnp.float32, -bound, bound)
    b = jax.random.uniform(kb, (out_dim,), jnp.float32, -bound, bound)
    return w, b


def init_fcnet(key, ip_dim, num_nodes, op_dim, num_layers):
    keys = jax.random.split(key, num_layers + 1)
    hidden = []
    w, b = init_linear(keys[0], ip_dim, num_nodes)  # fc1 + bn1
    hidden.append(dict(w=w, b=b, gamma=jnp.ones((num_nodes,), jnp.float32),
                       beta=jnp.zeros((num_nodes,), jnp.float32)))
    for i in range(num_layers - 1):                 # self.features blocks
        w, b = init_linear(keys[1 + i], num_nodes, num_nodes)
        hidden.append(dict(w=w, b=b, gamma=jnp.ones((num_nodes,), jnp.float32),
                           beta=jnp.zeros((num_nodes,), jnp.float32)))
    w_out, b_out = init_linear(keys[-1], num_nodes, op_dim)
    return dict(hidden=hidden, out_w=w_out, out_b=b_out)


# ---------------------------------------------------------------------------
# Packing: per-dimension lane padding + bf16 weights + per-net feature stacks.
# Hidden-layer biases are NOT packed (BN cancels them exactly).
# ---------------------------------------------------------------------------
def _round_up_lane(n):
    return int(-(-int(n) // LANE) * LANE)


def _pack_w(w, kp, np_):
    k, n = w.shape
    wp = jnp.zeros((kp, np_), jnp.float32).at[:k, :n].set(w)
    return wp.astype(jnp.bfloat16)


def _pack_gb(gamma, beta, np_):
    n = gamma.shape[0]
    return (jnp.zeros((2, np_), jnp.float32)
            .at[0, :n].set(gamma)
            .at[1, :n].set(beta))


def _pack_bias(b, np_):
    n = b.shape[0]
    return jnp.zeros((1, np_), jnp.float32).at[0, :n].set(b)


def _pack_inf_out(w, b, latent_dim, kp, lp):
    # Place mu columns at [0:L] and pre-std columns at [lp:lp+L] so the kernel splits z
    # with cheap lane-aligned static slices (no cross-lane shifts).
    k, _ = w.shape
    L = latent_dim
    wp = (jnp.zeros((kp, 2 * lp), jnp.float32)
          .at[:k, :L].set(w[:, :L])
          .at[:k, lp:lp + L].set(w[:, L:]))
    bp = (jnp.zeros((1, 2 * lp), jnp.float32)
          .at[0, :L].set(b[:L])
          .at[0, lp:lp + L].set(b[L:]))
    return wp.astype(jnp.bfloat16), bp


def pack_dipvae_params(params, op_dim, num_nodes, latent_dim):
    """Returns (arrays_dict, static_meta_dict).  arrays_dict contains only jnp arrays so it
    can be passed straight through jax.jit; meta carries Python ints (bound statically)."""
    dp = _round_up_lane(op_dim)       # flattened input / reconstruction pad
    hp = _round_up_lane(num_nodes)    # hidden width pad
    lp = _round_up_lane(latent_dim)   # latent pad

    def pack_net(net, in_pad):
        h0 = net["hidden"][0]
        w1 = _pack_w(h0["w"], in_pad, hp)
        p1 = _pack_gb(h0["gamma"], h0["beta"], hp)
        feats = net["hidden"][1:]
        if feats:
            wf = jnp.stack([_pack_w(l["w"], hp, hp) for l in feats])
            pf = jnp.stack([_pack_gb(l["gamma"], l["beta"], hp) for l in feats])
        else:  # dummy slab, never read (static loop count is 0)
            wf = jnp.zeros((1, hp, hp), jnp.bfloat16)
            pf = jnp.zeros((1, 2, hp), jnp.float32)
        return w1, p1, wf, pf, len(feats)

    inf_w1, inf_p1, inf_wf, inf_pf, n_inf_feat = pack_net(params["inference"], dp)
    gen_w1, gen_p1, gen_wf, gen_pf, n_gen_feat = pack_net(params["generative"], lp)

    inf_ow, inf_ob = _pack_inf_out(params["inference"]["out_w"],
                                   params["inference"]["out_b"], latent_dim, hp, lp)
    gen_ow = _pack_w(params["generative"]["out_w"], hp, dp)
    gen_ob = _pack_bias(params["generative"]["out_b"], dp)

    arrays = dict(inf_w1=inf_w1, inf_p1=inf_p1, inf_wf=inf_wf, inf_pf=inf_pf,
                  inf_ow=inf_ow, inf_ob=inf_ob,
                  gen_w1=gen_w1, gen_p1=gen_p1, gen_wf=gen_wf, gen_pf=gen_pf,
                  gen_ow=gen_ow, gen_ob=gen_ob)
    meta = dict(n_inf_feat=n_inf_feat, n_gen_feat=n_gen_feat)
    return arrays, meta


def _pad_cols(a, to):
    extra = int(to) - a.shape[-1]      # static shapes -> plain Python int
    if extra == 0:
        return a
    return jnp.pad(a, [(0, 0)] * (a.ndim - 1) + [(0, extra)])


# ---------------------------------------------------------------------------
# Single fused pallas_call for the whole forward pass (no grid: whole arrays
# VMEM-resident, no double-buffering / pipeline bookkeeping).
# ---------------------------------------------------------------------------
def dipvae_forward(x, packed, eps, *, latent_dim, op_dim, n_inf_feat, n_gen_feat):
    B = x.shape[0]
    dp = packed["inf_w1"].shape[0]      # input pad (static)
    lp = packed["gen_w1"].shape[0]      # latent pad (static)
    dout_p = packed["gen_ow"].shape[1]  # output pad (static)

    x_flat = x.reshape(B, -1)           # x.squeeze().view(B, -1)
    xp = _pad_cols(x_flat, dp)
    epsp = _pad_cols(eps, lp)

    kernel = functools.partial(_fused_dipvae_kernel,
                               n_inf_feat=n_inf_feat,
                               n_gen_feat=n_gen_feat,
                               lat_pad=lp)

    args = (xp, epsp,
            packed["inf_w1"], packed["inf_p1"], packed["inf_wf"], packed["inf_pf"],
            packed["inf_ow"], packed["inf_ob"],
            packed["gen_w1"], packed["gen_p1"], packed["gen_wf"], packed["gen_pf"],
            packed["gen_ow"], packed["gen_ob"])

    # VMEM limit sized to the resident slabs + outputs + headroom (don't rely on the
    # scoped default when dims scale).
    total_bytes = sum(a.size * a.dtype.itemsize for a in args)
    total_bytes += B * (dout_p + 2 * lp) * 4
    vmem_limit = int(min(100 << 20, max(16 << 20, 2 * total_bytes + (4 << 20))))

    vmem = pltpu.MemorySpace.VMEM
    # TODO(synk): for throughput, stack G independent batches along the sublane axis and
    # compute BN stats per group (reshape to (G, B, N), reduce axis=1) to amortize the
    # launch and weight DMAs.  Do NOT shard the batch across TensorCores / grid programs:
    # train-mode BatchNorm statistics must stay full-batch; if 2-TC v7x utilization is
    # ever needed, shard the hidden feature dimension instead.
    recon_p, mustd = pl.pallas_call(
        kernel,
        out_shape=(jax.ShapeDtypeStruct((B, dout_p), jnp.float32),
                   jax.ShapeDtypeStruct((B, 2 * lp), jnp.float32)),
        in_specs=[pl.BlockSpec(memory_space=vmem) for _ in args],
        out_specs=(pl.BlockSpec(memory_space=vmem),
                   pl.BlockSpec(memory_space=vmem)),
        compiler_params=pltpu.CompilerParams(vmem_limit_bytes=vmem_limit),
    )(*args)

    recon = recon_p[:, :op_dim]
    mu_z = mustd[:, :latent_dim]
    std_z = mustd[:, lp:lp + latent_dim]
    return recon, mu_z, std_z


# ---------------------------------------------------------------------------
# Pure-JAX reference (mirrors the PyTorch forward) for correctness checks.
# cast=None -> full f32 semantics; cast=jnp.bfloat16 -> same matmul precision as kernel.
# ---------------------------------------------------------------------------
def reference_forward(x, params, eps, latent_dim, cast=None):
    def mm(a, w):
        if cast is not None:
            a, w = a.astype(cast), w.astype(cast)
        return jnp.dot(a, w, preferred_element_type=jnp.float32)

    def fcnet(h, p):
        for layer in p["hidden"]:
            h = mm(h, layer["w"]) + layer["b"]
            mean = h.mean(0, keepdims=True)
            var = ((h - mean) ** 2).mean(0, keepdims=True)
            h = (h - mean) / jnp.sqrt(var + BN_EPS) * layer["gamma"] + layer["beta"]
            h = jnp.maximum(h, 0.0)
        return mm(h, p["out_w"]) + p["out_b"]

    x_flat = x.reshape(x.shape[0], -1)
    z = fcnet(x_flat, params["inference"])
    mu = z[:, :latent_dim]
    std = jax.nn.softplus(z[:, latent_dim:])
    zs = mu + eps * std
    recon = jax.nn.sigmoid(fcnet(zs, params["generative"]))
    return recon, mu, std


# ---------------------------------------------------------------------------
if __name__ == "__main__":
    # Small, forward-consistent shapes
    B, C, H, W = 8, 1, 8, 8
    OP_DIM = C * H * W          # 64 (flattened input / reconstruction dim)
    NUM_NODES = 32
    LATENT_DIM = 8
    NUM_INFERENCE_LAYERS = 2
    NUM_GEN_LAYERS = 2

    root = jax.random.PRNGKey(0)
    k_x, k_eps, k_inf, k_gen = jax.random.split(root, 4)

    x = jax.random.uniform(k_x, (B, C, H, W), jnp.float32)        # NCHW input
    eps = jax.random.normal(k_eps, (B, LATENT_DIM), jnp.float32)  # reparam noise

    params = dict(
        inference=init_fcnet(k_inf, OP_DIM, NUM_NODES, 2 * LATENT_DIM, NUM_INFERENCE_LAYERS),
        generative=init_fcnet(k_gen, LATENT_DIM, NUM_NODES, OP_DIM, NUM_GEN_LAYERS),
    )
    packed, meta = pack_dipvae_params(params, OP_DIM, NUM_NODES, LATENT_DIM)

    fwd = jax.jit(functools.partial(dipvae_forward,
                                    latent_dim=LATENT_DIM, op_dim=OP_DIM,
                                    n_inf_feat=meta["n_inf_feat"],
                                    n_gen_feat=meta["n_gen_feat"]))
    recon, mu_z, std_z = fwd(x, packed, eps)
    jax.block_until_ready((recon, mu_z, std_z))

    assert recon.shape == (B, OP_DIM)
    assert mu_z.shape == (B, LATENT_DIM)
    assert std_z.shape == (B, LATENT_DIM)
    assert bool(jnp.all(std_z > 0.0))
    assert bool(jnp.all((recon >= 0.0) & (recon <= 1.0)))

    # Tight check against a reference using the same (bf16 MXU, f32 accumulate) precision.
    r_bf, mu_bf, std_bf = reference_forward(x, params, eps, LATENT_DIM, cast=jnp.bfloat16)
    assert bool(jnp.allclose(recon, r_bf, atol=5e-3, rtol=5e-3))
    assert bool(jnp.allclose(mu_z, mu_bf, atol=5e-3, rtol=5e-3))
    assert bool(jnp.allclose(std_z, std_bf, atol=5e-3, rtol=5e-3))

    # Loose semantic check against the full-f32 reference (difference = bf16 weights only).
    r_ref, mu_ref, std_ref = reference_forward(x, params, eps, LATENT_DIM, cast=None)
    assert bool(jnp.allclose(recon, r_ref, atol=1e-1, rtol=1e-1))
    assert bool(jnp.allclose(mu_z, mu_ref, atol=1e-1, rtol=1e-1))
    assert bool(jnp.allclose(std_z, std_ref, atol=1e-1, rtol=1e-1))

    # TODO(synk): neg_elbo / DIP regularizer / likelihoods are training-time losses, not
    # part of forward(); omitted.
    print("KERNEL_OK")
</pallas_src>

<mosaic_0001>
module attributes {stable_mosaic.version = 11 : i64} {
  func.func @_fused_dipvae_kernel(%arg0: memref<8x128xf32, #tpu.memory_space<vmem>>, %arg1: memref<8x128xf32, #tpu.memory_space<vmem>>, %arg2: memref<128x128xbf16, #tpu.memory_space<vmem>>, %arg3: memref<2x128xf32, #tpu.memory_space<vmem>>, %arg4: memref<1x128x128xbf16, #tpu.memory_space<vmem>>, %arg5: memref<1x2x128xf32, #tpu.memory_space<vmem>>, %arg6: memref<128x256xbf16, #tpu.memory_space<vmem>>, %arg7: memref<1x256xf32, #tpu.memory_space<vmem>>, %arg8: memref<128x128xbf16, #tpu.memory_space<vmem>>, %arg9: memref<2x128xf32, #tpu.memory_space<vmem>>, %arg10: memref<1x128x128xbf16, #tpu.memory_space<vmem>>, %arg11: memref<1x2x128xf32, #tpu.memory_space<vmem>>, %arg12: memref<128x128xbf16, #tpu.memory_space<vmem>>, %arg13: memref<1x128xf32, #tpu.memory_space<vmem>>, %arg14: memref<8x128xf32, #tpu.memory_space<vmem>>, %arg15: memref<8x256xf32, #tpu.memory_space<vmem>>) attributes {dimension_semantics = [], scalar_prefetch = 0 : i64, scratch_operands = 0 : i64, tpu.core_type = #tpu.core_type<tc>} {
    %c0 = arith.constant 0 : index
    %c0_0 = arith.constant 0 : index
    %0 = vector.load %arg0[%c0, %c0_0] : memref<8x128xf32, #tpu.memory_space<vmem>>, vector<8x128xf32>
    %c0_1 = arith.constant 0 : index
    %c0_2 = arith.constant 0 : index
    %1 = vector.load %arg2[%c0_1, %c0_2] : memref<128x128xbf16, #tpu.memory_space<vmem>>, vector<128x128xbf16>
    %2 = arith.truncf %0 : vector<8x128xf32> to vector<8x128xbf16>
    %cst = arith.constant dense<0.000000e+00> : vector<8x128xf32>
    %3 = tpu.matmul %2, %1, %cst {dimension_numbers = #tpu.dot_dimension_numbers<[1], [0], [0], [1], [0, 0, 1, 1], [], []>} : vector<8x128xbf16>, vector<128x128xbf16>, vector<8x128xf32> -> vector<8x128xf32>
    %c0_3 = arith.constant 0 : index
    %c0_4 = arith.constant 0 : index
    %4 = vector.load %arg3[%c0_3, %c0_4] : memref<2x128xf32, #tpu.memory_space<vmem>>, vector<2x128xf32>
    %5 = vector.extract_strided_slice %4 {offsets = [0, 0], sizes = [1, 128], strides = [1, 1]} : vector<2x128xf32> to vector<1x128xf32>
    %6 = vector.extract_strided_slice %4 {offsets = [1, 0], sizes = [1, 128], strides = [1, 1]} : vector<2x128xf32> to vector<1x128xf32>
    %cst_5 = arith.constant dense<0.000000e+00> : vector<128xf32>
    %7 = vector.multi_reduction <add>, %3, %cst_5 [0] : vector<8x128xf32> to vector<128xf32>
    %8 = vector.shape_cast %7 : vector<128xf32> to vector<1x128xf32>
    %cst_6 = arith.constant 8.000000e+00 : f32
    %9 = vector.broadcast %cst_6 : f32 to vector<1x128xf32>
    %10 = arith.divf %8, %9 : vector<1x128xf32>
    %11 = arith.mulf %3, %3 : vector<8x128xf32>
    %cst_7 = arith.constant dense<0.000000e+00> : vector<128xf32>
    %12 = vector.multi_reduction <add>, %11, %cst_7 [0] : vector<8x128xf32> to vector<128xf32>
    %13 = vector.shape_cast %12 : vector<128xf32> to vector<1x128xf32>
    %cst_8 = arith.constant 8.000000e+00 : f32
    %14 = vector.broadcast %cst_8 : f32 to vector<1x128xf32>
    %15 = arith.divf %13, %14 : vector<1x128xf32>
    %16 = arith.mulf %10, %10 : vector<1x128xf32>
    %17 = arith.subf %15, %16 : vector<1x128xf32>
    %cst_9 = arith.constant 0.000000e+00 : f32
    %18 = vector.broadcast %cst_9 : f32 to vector<1x128xf32>
    %19 = arith.maximumf %17, %18 : vector<1x128xf32>
    %cst_10 = arith.constant 9.99999974E-6 : f32
    %20 = vector.broadcast %cst_10 : f32 to vector<1x128xf32>
    %21 = arith.addf %19, %20 : vector<1x128xf32>
    %22 = math.rsqrt %21 : vector<1x128xf32>
    %23 = arith.mulf %22, %5 : vector<1x128xf32>
    %24 = arith.mulf %10, %23 : vector<1x128xf32>
    %25 = arith.subf %6, %24 : vector<1x128xf32>
    %26 = vector.broadcast %23 : vector<1x128xf32> to vector<8x128xf32>
    %27 = arith.mulf %3, %26 : vector<8x128xf32>
    %28 = vector.broadcast %25 : vector<1x128xf32> to vector<8x128xf32>
    %29 = arith.addf %27, %28 : vector<8x128xf32>
    %cst_11 = arith.constant 0.000000e+00 : f32
    %30 = vector.broadcast %cst_11 : f32 to vector<8x128xf32>
    %31 = arith.maximumf %29, %30 : vector<8x128xf32>
    %c0_12 = arith.constant 0 : index
    %c0_13 = arith.constant 0 : index
    %c0_14 = arith.constant 0 : index
    %32 = vector.load %arg4[%c0_12, %c0_13, %c0_14] : memref<1x128x128xbf16, #tpu.memory_space<vmem>>, vector<1x128x128xbf16>
    %33 = vector.shape_cast %32 : vector<1x128x128xbf16> to vector<128x128xbf16>
    %34 = arith.truncf %31 : vector<8x128xf32> to vector<8x128xbf16>
    %cst_15 = arith.constant dense<0.000000e+00> : vector<8x128xf32>
    %35 = tpu.matmul %34, %33, %cst_15 {dimension_numbers = #tpu.dot_dimension_numbers<[1], [0], [0], [1], [0, 0, 1, 1], [], []>} : vector<8x128xbf16>, vector<128x128xbf16>, vector<8x128xf32> -> vector<8x128xf32>
    %c0_16 = arith.constant 0 : index
    %c0_17 = arith.constant 0 : index
    %c0_18 = arith.constant 0 : index
    %36 = vector.load %arg5[%c0_16, %c0_17, %c0_18] : memref<1x2x128xf32, #tpu.memory_space<vmem>>, vector<1x2x128xf32>
    %37 = vector.shape_cast %36 : vector<1x2x128xf32> to vector<2x128xf32>
    %38 = vector.extract_strided_slice %37 {offsets = [0, 0], sizes = [1, 128], strides = [1, 1]} : vector<2x128xf32> to vector<1x128xf32>
    %39 = vector.extract_strided_slice %37 {offsets = [1, 0], sizes = [1, 128], strides = [1, 1]} : vector<2x128xf32> to vector<1x128xf32>
    %cst_19 = arith.constant dense<0.000000e+00> : vector<128xf32>
    %40 = vector.multi_reduction <add>, %35, %cst_19 [0] : vector<8x128xf32> to vector<128xf32>
    %41 = vector.shape_cast %40 : vector<128xf32> to vector<1x128xf32>
    %cst_20 = arith.constant 8.000000e+00 : f32
    %42 = vector.broadcast %cst_20 : f32 to vector<1x128xf32>
    %43 = arith.divf %41, %42 : vector<1x128xf32>
    %44 = arith.mulf %35, %35 : vector<8x128xf32>
    %cst_21 = arith.constant dense<0.000000e+00> : vector<128xf32>
    %45 = vector.multi_reduction <add>, %44, %cst_21 [0] : vector<8x128xf32> to vector<128xf32>
    %46 = vector.shape_cast %45 : vector<128xf32> to vector<1x128xf32>
    %cst_22 = arith.constant 8.000000e+00 : f32
    %47 = vector.broadcast %cst_22 : f32 to vector<1x128xf32>
    %48 = arith.divf %46, %47 : vector<1x128xf32>
    %49 = arith.mulf %43, %43 : vector<1x128xf32>
    %50 = arith.subf %48, %49 : vector<1x128xf32>
    %cst_23 = arith.constant 0.000000e+00 : f32
    %51 = vector.broadcast %cst_23 : f32 to vector<1x128xf32>
    %52 = arith.maximumf %50, %51 : vector<1x128xf32>
    %cst_24 = arith.constant 9.99999974E-6 : f32
    %53 = vector.broadcast %cst_24 : f32 to vector<1x128xf32>
    %54 = arith.addf %52, %53 : vector<1x128xf32>
    %55 = math.rsqrt %54 : vector<1x128xf32>
    %56 = arith.mulf %55, %38 : vector<1x128xf32>
    %57 = arith.mulf %43, %56 : vector<1x128xf32>
    %58 = arith.subf %39, %57 : vector<1x128xf32>
    %59 = vector.broadcast %56 : vector<1x128xf32> to vector<8x128xf32>
    %60 = arith.mulf %35, %59 : vector<8x128xf32>
    %61 = vector.broadcast %58 : vector<1x128xf32> to vector<8x128xf32>
    %62 = arith.addf %60, %61 : vector<8x128xf32>
    %cst_25 = arith.constant 0.000000e+00 : f32
    %63 = vector.broadcast %cst_25 : f32 to vector<8x128xf32>
    %64 = arith.maximumf %62, %63 : vector<8x128xf32>
    %c0_26 = arith.constant 0 : index
    %c0_27 = arith.constant 0 : index
    %65 = vector.load %arg6[%c0_26, %c0_27] : memref<128x256xbf16, #tpu.memory_space<vmem>>, vector<128x256xbf16>
    %66 = arith.truncf %64 : vector<8x128xf32> to vector<8x128xbf16>
    %cst_28 = arith.constant dense<0.000000e+00> : vector<8x256xf32>
    %67 = tpu.matmul %66, %65, %cst_28 {dimension_numbers = #tpu.dot_dimension_numbers<[1], [0], [0], [1], [0, 0, 1, 1], [], []>} : vector<8x128xbf16>, vector<128x256xbf16>, vector<8x256xf32> -> vector<8x256xf32>
    %c0_29 = arith.constant 0 : index
    %c0_30 = arith.constant 0 : index
    %68 = vector.load %arg7[%c0_29, %c0_30] : memref<1x256xf32, #tpu.memory_space<vmem>>, vector<1x256xf32>
    %69 = vector.broadcast %68 : vector<1x256xf32> to vector<8x256xf32>
    %70 = arith.addf %67, %69 : vector<8x256xf32>
    %71 = vector.extract_strided_slice %70 {offsets = [0, 0], sizes = [8, 128], strides = [1, 1]} : vector<8x256xf32> to vector<8x128xf32>
    %72 = vector.extract_strided_slice %70 {offsets = [0, 128], sizes = [8, 128], strides = [1, 1]} : vector<8x256xf32> to vector<8x128xf32>
    %cst_31 = arith.constant 2.000000e+01 : f32
    %73 = vector.broadcast %cst_31 : f32 to vector<8x128xf32>
    %74 = arith.cmpf ogt, %72, %73 : vector<8x128xf32>
    %cst_32 = arith.constant 2.000000e+01 : f32
    %75 = vector.broadcast %cst_32 : f32 to vector<8x128xf32>
    %76 = arith.minimumf %72, %75 : vector<8x128xf32>
    %77 = math.exp %76 : vector<8x128xf32>
    %78 = math.log1p %77 : vector<8x128xf32>
    %79 = arith.select %74, %72, %78 : vector<8x128xi1>, vector<8x128xf32>
    %c0_33 = arith.constant 0 : index
    %c0_34 = arith.constant 0 : index
    %80 = vector.load %arg1[%c0_33, %c0_34] : memref<8x128xf32, #tpu.memory_space<vmem>>, vector<8x128xf32>
    %81 = arith.mulf %80, %79 : vector<8x128xf32>
    %82 = arith.addf %71, %81 : vector<8x128xf32>
    %c0_35 = arith.constant 0 : index
    %c0_36 = arith.constant 0 : index
    %83 = vector.load %arg15[%c0_35, %c0_36] : memref<8x256xf32, #tpu.memory_space<vmem>>, vector<8x128xf32>
    tpu.vector_store %arg15[%c0_35, %c0_36], %71 {strides = array<i32>} : memref<8x256xf32, #tpu.memory_space<vmem>>, vector<8x128xf32>,
    %c0_37 = arith.constant 0 : index
    %c128 = arith.constant 128 : index
    %84 = vector.load %arg15[%c0_37, %c128] : memref<8x256xf32, #tpu.memory_space<vmem>>, vector<8x128xf32>
    tpu.vector_store %arg15[%c0_37, %c128], %79 {strides = array<i32>} : memref<8x256xf32, #tpu.memory_space<vmem>>, vector<8x128xf32>,
    %c0_38 = arith.constant 0 : index
    %c0_39 = arith.constant 0 : index
    %85 = vector.load %arg8[%c0_38, %c0_39] : memref<128x128xbf16, #tpu.memory_space<vmem>>, vector<128x128xbf16>
    %86 = arith.truncf %82 : vector<8x128xf32> to vector<8x128xbf16>
    %cst_40 = arith.constant dense<0.000000e+00> : vector<8x128xf32>
    %87 = tpu.matmul %86, %85, %cst_40 {dimension_numbers = #tpu.dot_dimension_numbers<[1], [0], [0], [1], [0, 0, 1, 1], [], []>} : vector<8x128xbf16>, vector<128x128xbf16>, vector<8x128xf32> -> vector<8x128xf32>
    %c0_41 = arith.constant 0 : index
    %c0_42 = arith.constant 0 : index
    %88 = vector.load %arg9[%c0_41, %c0_42] : memref<2x128xf32, #tpu.memory_space<vmem>>, vector<2x128xf32>
    %89 = vector.extract_strided_slice %88 {offsets = [0, 0], sizes = [1, 128], strides = [1, 1]} : vector<2x128xf32> to vector<1x128xf32>
    %90 = vector.extract_strided_slice %88 {offsets = [1, 0], sizes = [1, 128], strides = [1, 1]} : vector<2x128xf32> to vector<1x128xf32>
    %cst_43 = arith.constant dense<0.000000e+00> : vector<128xf32>
    %91 = vector.multi_reduction <add>, %87, %cst_43 [0] : vector<8x128xf32> to vector<128xf32>
    %92 = vector.shape_cast %91 : vector<128xf32> to vector<1x128xf32>
    %cst_44 = arith.constant 8.000000e+00 : f32
    %93 = vector.broadcast %cst_44 : f32 to vector<1x128xf32>
    %94 = arith.divf %92, %93 : vector<1x128xf32>
    %95 = arith.mulf %87, %87 : vector<8x128xf32>
    %cst_45 = arith.constant dense<0.000000e+00> : vector<128xf32>
    %96 = vector.multi_reduction <add>, %95, %cst_45 [0] : vector<8x128xf32> to vector<128xf32>
    %97 = vector.shape_cast %96 : vector<128xf32> to vector<1x128xf32>
    %cst_46 = arith.constant 8.000000e+00 : f32
    %98 = vector.broadcast %cst_46 : f32 to vector<1x128xf32>
    %99 = arith.divf %97, %98 : vector<1x128xf32>
    %100 = arith.mulf %94, %94 : vector<1x128xf32>
    %101 = arith.subf %99, %100 : vector<1x128xf32>
    %cst_47 = arith.constant 0.000000e+00 : f32
    %102 = vector.broadcast %cst_47 : f32 to vector<1x128xf32>
    %103 = arith.maximumf %101, %102 : vector<1x128xf32>
    %cst_48 = arith.constant 9.99999974E-6 : f32
    %104 = vector.broadcast %cst_48 : f32 to vector<1x128xf32>
    %105 = arith.addf %103, %104 : vector<1x128xf32>
    %106 = math.rsqrt %105 : vector<1x128xf32>
    %107 = arith.mulf %106, %89 : vector<1x128xf32>
    %108 = arith.mulf %94, %107 : vector<1x128xf32>
    %109 = arith.subf %90, %108 : vector<1x128xf32>
    %110 = vector.broadcast %107 : vector<1x128xf32> to vector<8x128xf32>
    %111 = arith.mulf %87, %110 : vector<8x128xf32>
    %112 = vector.broadcast %109 : vector<1x128xf32> to vector<8x128xf32>
    %113 = arith.addf %111, %112 : vector<8x128xf32>
    %cst_49 = arith.constant 0.000000e+00 : f32
    %114 = vector.broadcast %cst_49 : f32 to vector<8x128xf32>
    %115 = arith.maximumf %113, %114 : vector<8x128xf32>
    %c0_50 = arith.constant 0 : index
    %c0_51 = arith.constant 0 : index
    %c0_52 = arith.constant 0 : index
    %116 = vector.load %arg10[%c0_50, %c0_51, %c0_52] : memref<1x128x128xbf16, #tpu.memory_space<vmem>>, vector<1x128x128xbf16>
    %117 = vector.shape_cast %116 : vector<1x128x128xbf16> to vector<128x128xbf16>
    %118 = arith.truncf %115 : vector<8x128xf32> to vector<8x128xbf16>
    %cst_53 = arith.constant dense<0.000000e+00> : vector<8x128xf32>
    %119 = tpu.matmul %118, %117, %cst_53 {dimension_numbers = #tpu.dot_dimension_numbers<[1], [0], [0], [1], [0, 0, 1, 1], [], []>} : vector<8x128xbf16>, vector<128x128xbf16>, vector<8x128xf32> -> vector<8x128xf32>
    %c0_54 = arith.constant 0 : index
    %c0_55 = arith.constant 0 : index
    %c0_56 = arith.constant 0 : index
    %120 = vector.load %arg11[%c0_54, %c0_55, %c0_56] : memref<1x2x128xf32, #tpu.memory_space<vmem>>, vector<1x2x128xf32>
    %121 = vector.shape_cast %120 : vector<1x2x128xf32> to vector<2x128xf32>
    %122 = vector.extract_strided_slice %121 {offsets = [0, 0], sizes = [1, 128], strides = [1, 1]} : vector<2x128xf32> to vector<1x128xf32>
    %123 = vector.extract_strided_slice %121 {offsets = [1, 0], sizes = [1, 128], strides = [1, 1]} : vector<2x128xf32> to vector<1x128xf32>
    %cst_57 = arith.constant dense<0.000000e+00> : vector<128xf32>
    %124 = vector.multi_reduction <add>, %119, %cst_57 [0] : vector<8x128xf32> to vector<128xf32>
    %125 = vector.shape_cast %124 : vector<128xf32> to vector<1x128xf32>
    %cst_58 = arith.constant 8.000000e+00 : f32
    %126 = vector.broadcast %cst_58 : f32 to vector<1x128xf32>
    %127 = arith.divf %125, %126 : vector<1x128xf32>
    %128 = arith.mulf %119, %119 : vector<8x128xf32>
    %cst_59 = arith.constant dense<0.000000e+00> : vector<128xf32>
    %129 = vector.multi_reduction <add>, %128, %cst_59 [0] : vector<8x128xf32> to vector<128xf32>
    %130 = vector.shape_cast %129 : vector<128xf32> to vector<1x128xf32>
    %cst_60 = arith.constant 8.000000e+00 : f32
    %131 = vector.broadcast %cst_60 : f32 to vector<1x128xf32>
    %132 = arith.divf %130, %131 : vector<1x128xf32>
    %133 = arith.mulf %127, %127 : vector<1x128xf32>
    %134 = arith.subf %132, %133 : vector<1x128xf32>
    %cst_61 = arith.constant 0.000000e+00 : f32
    %135 = vector.broadcast %cst_61 : f32 to vector<1x128xf32>
    %136 = arith.maximumf %134, %135 : vector<1x128xf32>
    %cst_62 = arith.constant 9.99999974E-6 : f32
    %137 = vector.broadcast %cst_62 : f32 to vector<1x128xf32>
    %138 = arith.addf %136, %137 : vector<1x128xf32>
    %139 = math.rsqrt %138 : vector<1x128xf32>
    %140 = arith.mulf %139, %122 : vector<1x128xf32>
    %141 = arith.mulf %127, %140 : vector<1x128xf32>
    %142 = arith.subf %123, %141 : vector<1x128xf32>
    %143 = vector.broadcast %140 : vector<1x128xf32> to vector<8x128xf32>
    %144 = arith.mulf %119, %143 : vector<8x128xf32>
    %145 = vector.broadcast %142 : vector<1x128xf32> to vector<8x128xf32>
    %146 = arith.addf %144, %145 : vector<8x128xf32>
    %cst_63 = arith.constant 0.000000e+00 : f32
    %147 = vector.broadcast %cst_63 : f32 to vector<8x128xf32>
    %148 = arith.maximumf %146, %147 : vector<8x128xf32>
    %c0_64 = arith.constant 0 : index
    %c0_65 = arith.constant 0 : index
    %149 = vector.load %arg12[%c0_64, %c0_65] : memref<128x128xbf16, #tpu.memory_space<vmem>>, vector<128x128xbf16>
    %150 = arith.truncf %148 : vector<8x128xf32> to vector<8x128xbf16>
    %cst_66 = arith.constant dense<0.000000e+00> : vector<8x128xf32>
    %151 = tpu.matmul %150, %149, %cst_66 {dimension_numbers = #tpu.dot_dimension_numbers<[1], [0], [0], [1], [0, 0, 1, 1], [], []>} : vector<8x128xbf16>, vector<128x128xbf16>, vector<8x128xf32> -> vector<8x128xf32>
    %c0_67 = arith.constant 0 : index
    %c0_68 = arith.constant 0 : index
    %152 = vector.load %arg13[%c0_67, %c0_68] : memref<1x128xf32, #tpu.memory_space<vmem>>, vector<1x128xf32>
    %153 = vector.broadcast %152 : vector<1x128xf32> to vector<8x128xf32>
    %154 = arith.addf %151, %153 : vector<8x128xf32>
    %155 = arith.negf %154 : vector<8x128xf32>
    %156 = math.exp %155 : vector<8x128xf32>
    %cst_69 = arith.constant 1.000000e+00 : f32
    %157 = vector.broadcast %cst_69 : f32 to vector<8x128xf32>
    %158 = arith.addf %157, %156 : vector<8x128xf32>
    %159 = arith.divf %157, %158 : vector<8x128xf32>
    %c0_70 = arith.constant 0 : index
    %c0_71 = arith.constant 0 : index
    %160 = vector.load %arg14[%c0_70, %c0_71] : memref<8x128xf32, #tpu.memory_space<vmem>>, vector<8x128xf32>
    tpu.vector_store %arg14[%c0_70, %c0_71], %159 {strides = array<i32>} : memref<8x128xf32, #tpu.memory_space<vmem>>, vector<8x128xf32>,
    return
  }
}

</mosaic_0001>

<bundles_post_ra>
// kernel: dipvae_forward.1
= control target key start
LH: loop header
LB: loop body
LE: loop exit
PB: predicated region body
PF: predicated region fallthrough
CT: control target
= control target key end

     0   :  { %21 = vsyncpa [#allocation3], 0  ;;  %s1954_s0 = inlined_call_operand.vmem [shape: f32[8,128], index: 0, kind: input, shape index: {}]   ;;  %s1955_s1 = inlined_call_operand.vmem [shape: f32[8,128], index: 1, kind: input, shape index: {}]   ;;  %s1956_s2 = inlined_call_operand.hbm [shape: bf16[128,128], index: 2, kind: input, shape index: {}]   ;;  %s1957_s3 = inlined_call_operand.vmem [shape: f32[2,128], index: 3, kind: input, shape index: {}]   ;;  %s1958_s4 = inlined_call_operand.hbm [shape: bf16[1,128,128], index: 4, kind: input, shape index: {}]   ;;  %s1959_s5 = inlined_call_operand.vmem [shape: f32[1,2,128], index: 5, kind: input, shape index: {}]   ;;  %s1960_s6 = inlined_call_operand.vmem [shape: bf16[128,256], index: 6, kind: input, shape index: {}]   ;;  %s1961_s7 = inlined_call_operand.hbm [shape: f32[1,256], index: 7, kind: input, shape index: {}]   ;;  %s1962_s8 = inlined_call_operand.hbm [shape: bf16[128,128], index: 8, kind: input, shape index: {}]   ;;  %s1963_s9 = inlined_call_operand.hbm [shape: f32[2,128], index: 9, kind: input, shape index: {}]   ;;  %s1964_s10 = inlined_call_operand.hbm [shape: bf16[1,128,128], index: 10, kind: input, shape index: {}]   ;;  %s1965_s11 = inlined_call_operand.hbm [shape: f32[1,2,128], index: 11, kind: input, shape index: {}]   ;;  %s1966_s12 = inlined_call_operand.hbm [shape: bf16[128,128], index: 12, kind: input, shape index: {}]   ;;  %s1967_s13 = inlined_call_operand.hbm [shape: f32[1,128], index: 13, kind: input, shape index: {}]   ;;  %s1968_s14 = inlined_call_operand.hbm [shape: f32[8,128], index: 14, kind: output, shape index: {0}]   ;;  %s1969_s15 = inlined_call_operand.vmem [shape: f32[8,256], index: 15, kind: output, shape index: {1}]  }
   0x1   :  { %22 = vsyncpa [#allocation6], 0 }
   0x2   :  { %23 = vsyncpa [#allocation9], 0 }
   0x3   :  { %24 = vsyncpa [#allocation12], 0 }
   0x4   :  { %25 = vsyncpa [#allocation15], 0 }
   0x5   :  { %26 = vsyncpa [#allocation4], 0  ;;  %s1580_s18 = smov [#allocation5]   ;;  %s1581_s20 = smov [#allocation8]  }
   0x6   :  { %s50_s19 = sshll.u32 %s1580_s18, 4  ;;  %s76_s21 = sshll.u32 %s1581_s20, 4  ;;  %s51_s19 = int_to_ptr.vmem [resolvable:$true] %s50_s19  ;;  %s1675_s21 = int_to_ptr.vmem [resolvable:$true] %s76_s21 }
   0x7   :  { %s1348_s24 = scalar_lea.hbm %s1958_s4, 1024 }
   0x8   :  { %p1349_p0 = scmp.ne.s32.totalorder %s1958_s4, %s1348_s24  ;;  %p1352_p1 = scmp.lt.u32.totalorder %s1348_s24, %s1958_s4 }
   0xa   :  { %p1354_p2 = pnand %p1352_p1, %p1349_p0 }
   0xc   :  { %1357 = shalt.err (!%p1354_p2)
}
   0xd   :  { %s1358_s29 = scalar_lea.vmem %s51_s19, 1024  ;;  %p1363_p4 = scmp.lt.s32.totalorder %s51_s19, %s51_s19 }
   0xe   :  { %p1359_p3 = scmp.ne.s32.totalorder %s51_s19, %s1358_s29  ;;  %p1364_p5 = scmp.lt.s32.totalorder %s1358_s29, %s1358_s29 }
  0x10   :  { %p1365_p6 = por %p1364_p5, %p1363_p4 }
  0x12   :  { %p1366_p7 = pnand %p1365_p6, %p1359_p3 }
  0x14   :  { %1369 = shalt.err (!%p1366_p7)
}
  0x15   :  { %s1582_s30 = smov 64   ;;  %s1583_s16 = smov 4  }
  0x16   :  { %56 = dma.hbm_to_vmem [thread:$0]  %s1958_s4, 1024, %s51_s19, [#allocation6], %s1582_s30, %s1582_s30, %s1583_s16  }
  0x17   :  { %s1370_s23 = scalar_lea.hbm %s1962_s8, 1024 }
  0x18   :  { %p1371_p8 = scmp.ne.s32.totalorder %s1962_s8, %s1370_s23  ;;  %p1374_p9 = scmp.lt.u32.totalorder %s1370_s23, %s1962_s8 }
  0x1a   :  { %p1376_p10 = pnand %p1374_p9, %p1371_p8 }
  0x1c   :  { %1379 = shalt.err (!%p1376_p10)
}
  0x1d   :  { %s1380_s28 = scalar_lea.vmem %s1675_s21, 1024  ;;  %p1385_p12 = scmp.lt.s32.totalorder %s1675_s21, %s1675_s21 }
  0x1e   :  { %p1381_p11 = scmp.ne.s32.totalorder %s1675_s21, %s1380_s28  ;;  %p1386_p13 = scmp.lt.s32.totalorder %s1380_s28, %s1380_s28 }
  0x20   :  { %p1387_p0 = por %p1386_p13, %p1385_p12 }
  0x22   :  { %p1388_p1 = pnand %p1387_p0, %p1381_p11 }
  0x24   :  { %1391 = shalt.err (!%p1388_p1)
}
  0x25   :  { %82 = dma.hbm_to_vmem [thread:$0]  %s1962_s8, 1024, %s1675_s21, [#allocation9], %s1582_s30, %s1582_s30, %s1583_s16  }
  0x26   :  { %s1584_s29 = smov [#allocation11]   ;;  %s1585_s18 = smov [#allocation14]  }
  0x27   :  { %s98_s17 = sshll.u32 %s1584_s29, 4  ;;  %s120_s20 = sshll.u32 %s1585_s18, 4  ;;  %s99_s17 = int_to_ptr.vmem [resolvable:$true] %s98_s17  ;;  %s1712_s20 = int_to_ptr.vmem [resolvable:$true] %s120_s20 }
  0x28   :  { %s1392_s24 = scalar_lea.hbm %s1964_s10, 1024 }
  0x29   :  { %p1393_p2 = scmp.ne.s32.totalorder %s1964_s10, %s1392_s24  ;;  %p1396_p3 = scmp.lt.u32.totalorder %s1392_s24, %s1964_s10 }
  0x2b   :  { %p1398_p4 = pnand %p1396_p3, %p1393_p2 }
  0x2d   :  { %1401 = shalt.err (!%p1398_p4)
}
  0x2e   :  { %s1402_s8 = scalar_lea.vmem %s99_s17, 1024  ;;  %p1407_p6 = scmp.lt.s32.totalorder %s99_s17, %s99_s17 }
  0x2f   :  { %p1403_p5 = scmp.ne.s32.totalorder %s99_s17, %s1402_s8  ;;  %p1408_p7 = scmp.lt.s32.totalorder %s1402_s8, %s1402_s8 }
  0x31   :  { %p1409_p8 = por %p1408_p7, %p1407_p6 }
  0x33   :  { %p1410_p9 = pnand %p1409_p8, %p1403_p5 }
  0x35   :  { %1413 = shalt.err (!%p1410_p9)
}
  0x36   :  { %104 = dma.hbm_to_vmem [thread:$0]  %s1964_s10, 1024, %s99_s17, [#allocation12], %s1582_s30, %s1582_s30, %s1583_s16  }
  0x37   :  { %s1414_s18 = scalar_lea.hbm %s1966_s12, 1024 }
  0x38   :  { %p1415_p10 = scmp.ne.s32.totalorder %s1966_s12, %s1414_s18  ;;  %p1418_p11 = scmp.lt.u32.totalorder %s1414_s18, %s1966_s12 }
  0x3a   :  { %p1420_p12 = pnand %p1418_p11, %p1415_p10 }
  0x3c   :  { %1423 = shalt.err (!%p1420_p12)
}
  0x3d   :  { %s1424_s26 = scalar_lea.vmem %s1712_s20, 1024  ;;  %p1429_p0 = scmp.lt.s32.totalorder %s1712_s20, %s1712_s20 }
  0x3e   :  { %p1425_p13 = scmp.ne.s32.totalorder %s1712_s20, %s1424_s26  ;;  %p1430_p1 = scmp.lt.s32.totalorder %s1424_s26, %s1424_s26 }
  0x40   :  { %p1431_p2 = por %p1430_p1, %p1429_p0 }
  0x42   :  { %p1432_p3 = pnand %p1431_p2, %p1425_p13 }
  0x44   :  { %1435 = shalt.err (!%p1432_p3)
}
  0x45   :  { %126 = dma.hbm_to_vmem [thread:$0]  %s1966_s12, 1024, %s1712_s20, [#allocation15], %s1582_s30, %s1582_s30, %s1583_s16  }
  0x46   :  { %s1586_s27 = smov [#allocation2]   ;;  %s1587_s8 = smov [#allocation7]  }
  0x47   :  { %s36_s28 = sshll.u32 %s1586_s27, 4  ;;  %s67_s21 = sshll.u32 %s1587_s8, 4  ;;  %s37_s28 = int_to_ptr.vmem [resolvable:$true] %s36_s28  ;;  %s68_s21 = int_to_ptr.vmem [resolvable:$true] %s67_s21 }
  0x48   :  { %s1436_s29 = scalar_lea.hbm %s1956_s2, 1024 }
  0x49   :  { %p1437_p4 = scmp.ne.s32.totalorder %s1956_s2, %s1436_s29  ;;  %p1440_p5 = scmp.lt.u32.totalorder %s1436_s29, %s1956_s2 }
  0x4b   :  { %p1442_p6 = pnand %p1440_p5, %p1437_p4 }
  0x4d   :  { %1445 = shalt.err (!%p1442_p6)
}
  0x4e   :  { %s1446_s12 = scalar_lea.vmem %s37_s28, 1024  ;;  %p1451_p8 = scmp.lt.s32.totalorder %s37_s28, %s37_s28 }
  0x4f   :  { %p1447_p7 = scmp.ne.s32.totalorder %s37_s28, %s1446_s12  ;;  %p1452_p9 = scmp.lt.s32.totalorder %s1446_s12, %s1446_s12 }
  0x51   :  { %p1453_p10 = por %p1452_p9, %p1451_p8 }
  0x53   :  { %p1454_p11 = pnand %p1453_p10, %p1447_p7 }
  0x55   :  { %1457 = shalt.err (!%p1454_p11)
}
  0x56   :  { %42 = dma.hbm_to_vmem [thread:$0]  %s1956_s2, 1024, %s37_s28, [#allocation3], %s1582_s30, %s1582_s30, %s1583_s16  }
  0x57   :  { %s1458_s17 = scalar_lea.hbm %s1961_s7, 32 }
  0x58   :  { %p1459_p12 = scmp.ne.s32.totalorder %s1961_s7, %s1458_s17  ;;  %p1462_p13 = scmp.lt.u32.totalorder %s1458_s17, %s1961_s7 }
  0x5a   :  { %p1464_p0 = pnand %p1462_p13, %p1459_p12 }
  0x5c   :  { %1467 = shalt.err (!%p1464_p0)
}
  0x5d   :  { %s1468_s29 = scalar_lea.vmem %s68_s21, 32  ;;  %p1473_p2 = scmp.lt.s32.totalorder %s68_s21, %s68_s21 }
  0x5e   :  { %p1469_p1 = scmp.ne.s32.totalorder %s68_s21, %s1468_s29  ;;  %p1474_p3 = scmp.lt.s32.totalorder %s1468_s29, %s1468_s29 }
  0x60   :  { %p1475_p4 = por %p1474_p3, %p1473_p2 }
  0x62   :  { %p1476_p5 = pnand %p1475_p4, %p1469_p1 }
  0x64   :  { %1479 = shalt.err (!%p1476_p5)
}
  0x65   :  { %70 = dma.hbm_to_vmem [thread:$0]  %s1961_s7, 32, %s68_s21, [#allocation6]  }
  0x66   :  { %s1588_s16 = smov [#allocation10]   ;;  %s1589_s18 = smov [#allocation13]  }
  0x67   :  { %s89_s28 = sshll.u32 %s1588_s16, 4  ;;  %s111_s22 = sshll.u32 %s1589_s18, 4  ;;  %s90_s28 = int_to_ptr.vmem [resolvable:$true] %s89_s28  ;;  %s112_s22 = int_to_ptr.vmem [resolvable:$true] %s111_s22 }
  0x68   :  { %s1480_s12 = scalar_lea.hbm %s1963_s9, 32 }
  0x69   :  { %p1481_p6 = scmp.ne.s32.totalorder %s1963_s9, %s1480_s12  ;;  %p1484_p7 = scmp.lt.u32.totalorder %s1480_s12, %s1963_s9 }
  0x6b   :  { %p1486_p8 = pnand %p1484_p7, %p1481_p6 }
  0x6d   :  { %1489 = shalt.err (!%p1486_p8)
}
  0x6e   :  { %s1490_s7 = scalar_lea.vmem %s90_s28, 32  ;;  %p1495_p10 = scmp.lt.s32.totalorder %s90_s28, %s90_s28 }
  0x6f   :  { %p1491_p9 = scmp.ne.s32.totalorder %s90_s28, %s1490_s7  ;;  %p1496_p11 = scmp.lt.s32.totalorder %s1490_s7, %s1490_s7 }
  0x71   :  { %p1497_p12 = por %p1496_p11, %p1495_p10 }
  0x73   :  { %p1498_p13 = pnand %p1497_p12, %p1491_p9 }
  0x75   :  { %1501 = shalt.err (!%p1498_p13)
}
  0x76   :  { %92 = dma.hbm_to_vmem [thread:$0]  %s1963_s9, 32, %s90_s28, [#allocation9]  }
  0x77   :  { %s1502_s4 = scalar_lea.hbm %s1965_s11, 32 }
  0x78   :  { %p1503_p0 = scmp.ne.s32.totalorder %s1965_s11, %s1502_s4  ;;  %p1506_p1 = scmp.lt.u32.totalorder %s1502_s4, %s1965_s11 }
  0x7a   :  { %p1508_p2 = pnand %p1506_p1, %p1503_p0 }
  0x7c   :  { %1511 = shalt.err (!%p1508_p2)
}
  0x7d   :  { %s1512_s16 = scalar_lea.vmem %s112_s22, 32  ;;  %p1517_p4 = scmp.lt.s32.totalorder %s112_s22, %s112_s22 }
  0x7e   :  { %p1513_p3 = scmp.ne.s32.totalorder %s112_s22, %s1512_s16  ;;  %p1518_p5 = scmp.lt.s32.totalorder %s1512_s16, %s1512_s16 }
  0x80   :  { %p1519_p6 = por %p1518_p5, %p1517_p4 }
  0x82   :  { %p1520_p7 = pnand %p1519_p6, %p1513_p3 }
  0x84   :  { %1523 = shalt.err (!%p1520_p7)
}
  0x85   :  { %114 = dma.hbm_to_vmem [thread:$0]  %s1965_s11, 32, %s112_s22, [#allocation12]  }
  0x86   :  { %s1590_s18 = smov [#allocation16]   ;;  %s1524_s20 = scalar_lea.hbm %s1967_s13, 16 }
  0x87   :  { %s133_s23 = sshll.u32 %s1590_s18, 4  ;;  %p1525_p8 = scmp.ne.s32.totalorder %s1967_s13, %s1524_s20  ;;  %s134_s23 = int_to_ptr.vmem [resolvable:$true] %s133_s23 }
  0x88   :  { %p1528_p9 = scmp.lt.u32.totalorder %s1524_s20, %s1967_s13 }
  0x8a   :  { %p1530_p10 = pnand %p1528_p9, %p1525_p8 }
  0x8c   :  { %1533 = shalt.err (!%p1530_p10)
}
  0x8d   :  { %s1534_s21 = scalar_lea.vmem %s134_s23, 16  ;;  %s1538_s11 = scalar_lea.vmem %s134_s23, 32 }
  0x8e   :  { %p1535_p11 = scmp.ne.s32.totalorder %s134_s23, %s1534_s21  ;;  %p1539_p12 = scmp.lt.s32.totalorder %s134_s23, %s134_s23 }
  0x8f   :  { %p1540_p13 = scmp.lt.s32.totalorder %s1538_s11, %s1534_s21 }
  0x91   :  { %p1541_p0 = por %p1540_p13, %p1539_p12 }
  0x93   :  { %p1542_p1 = pnand %p1541_p0, %p1535_p11 }
  0x95   :  { %1545 = shalt.err (!%p1542_p1)
}
  0x96   :  { %136 = dma.hbm_to_vmem [thread:$0]  %s1967_s13, 16, %s134_s23, [#allocation15]  }
  0x97   :  { %1568 = dma.done.wait [#allocation3], 1024  }
  0x98   :  { %1569 = vsyncadd [#allocation3], 4294966272 }
  0x99   :  { %1570 = dma.done.wait [#allocation6], 1056  }
  0x9a   :  { %1571 = vsyncadd [#allocation6], 4294966240 }
  0x9b   :  { %1572 = dma.done.wait [#allocation9], 1056  }
  0x9c   :  { %1573 = vsyncadd [#allocation9], 4294966240 }
  0x9d   :  { %1574 = dma.done.wait [#allocation12], 1056  }
  0x9e   :  { %1575 = vsyncadd [#allocation12], 4294966240 }
  0x9f   :  { %1576 = dma.done.wait [#allocation15], 1040  }
  0xa0   :  { %1577 = vsyncadd [#allocation15], 4294966256  ;;  %v1591_v0 = vmov 0.0   ;;  %vm1592_vm0 = vmmov 0   ;;  %v1268_v1 = vld [vmem:[#allocation2] sm:$0xff]   ;;  %v1269_v2 = vld [vmem:[#allocation2 + $0x8] sm:$0xff]   ;;  %v299_v42 = vlaneseq }
  0xa1   :  { %1153 = vmatprep.subr.bf16.mxu0 %v1591_v0  ;;  %1169 = vmatprep.mubr.msk.bf16.mxu0 %vm1592_vm0, %v1591_v0  ;;  %v1270_v3 = vld [vmem:[#allocation2 + $0x10] sm:$0xff]   ;;  %v1271_v4 = vld [vmem:[#allocation2 + $0x18] sm:$0xff]   ;;  %v1272_v5 = vld [vmem:[#allocation2 + $0x20] sm:$0xff]  }
  0xa2   :  { %1173 = vmatprep.subr.bf16.mxu1 %v1591_v0  ;;  %1189 = vmatprep.mubr.msk.bf16.mxu1 %vm1592_vm0, %v1591_v0  ;;  %v1273_v6 = vld [vmem:[#allocation2 + $0x28] sm:$0xff]   ;;  %v1274_v7 = vld [vmem:[#allocation2 + $0x30] sm:$0xff]   ;;  %v1275_v8 = vld [vmem:[#allocation2 + $0x38] sm:$0xff]   ;;  %v300_v43 = vshrl.u32 %v299_v42, 7 }
  0xa3   :  { %1154 = vmatpush3.bf16.msra.mxu0 %v1268_v1  ;;  %v165_v9 = vld [vmem:[%s1954_s0] sm:$0xff]  ;;  %v1277_v12 = vld [vmem:[#allocation5 + $0x8] sm:$0xff]   ;;  %v1278_v13 = vld [vmem:[#allocation5 + $0x10] sm:$0xff]  }
  0xa4   :  { %1155 = vmatprep.subr.bf16.mxu0 %v1591_v0  ;;  %v182_v10 = vpack.c.bf16 %v165_v9, %v165_v9  ;;  %v1276_v11 = vld [vmem:[#allocation5] sm:$0xff]   ;;  %v1279_v14 = vld [vmem:[#allocation5 + $0x18] sm:$0xff]   ;;  %v1281_v16 = vld [vmem:[#allocation5 + $0x28] sm:$0xff]   ;;  %v1839_v47 = vsub.s32 0, %v300_v43  ;;  %v1842_v51 = vsub.s32 1, %v300_v43 }
  0xa5   :  { %1174 = vmatpush3.bf16.msra.mxu1 %v1276_v11  ;;  %v1280_v15 = vld [vmem:[#allocation5 + $0x20] sm:$0xff]   ;;  %v1282_v17 = vld [vmem:[#allocation5 + $0x30] sm:$0xff]   ;;  %v1283_v18 = vld [vmem:[#allocation5 + $0x38] sm:$0xff]   ;;  %v1593_v11 = vmov 0  }
  0xa6   :  { %1175 = vmatprep.subr.bf16.mxu1 %v1591_v0  ;;  %v271_v44 = vld [vmem:[%s1957_s3] sm:$0x3]  ;;  %v1286_v58 = vld [vmem:[%s1960_s6 + $0x4] ss:$8 sps:$4 sm:$0xff]   ;;  %v1289_v60 = vld [vmem:[%s1960_s6 + $0x14] ss:$8 sps:$4 sm:$0xff]  }
  0xa7   :  { %1156 = vmatpush3.bf16.msra.mxu0 %v1269_v2  ;;  %v1284_v59 = vld [vmem:[%s1960_s6] ss:$8 sps:$4 sm:$0xff]   ;;  %v1287_v61 = vld [vmem:[%s1960_s6 + $0x10] ss:$8 sps:$4 sm:$0xff]   ;;  %v1292_v62 = vld [vmem:[%s1960_s6 + $0x24] ss:$8 sps:$4 sm:$0xff]  }
  0xa8   :  { %1157 = vmatprep.subr.bf16.mxu0 %v1591_v0  ;;  %v1290_v63 = vld [vmem:[%s1960_s6 + $0x20] ss:$8 sps:$4 sm:$0xff]   ;;  %v1295_v1 = vld [vmem:[%s1960_s6 + $0x34] ss:$8 sps:$4 sm:$0xff]   ;;  %v1293_v2 = vld [vmem:[%s1960_s6 + $0x30] ss:$8 sps:$4 sm:$0xff]  }
  0xa9   :  { %1176 = vmatpush3.bf16.msra.mxu1 %v1277_v12  ;;  %v1305_v9 = vld [vmem:[%s1960_s6 + $0x70] ss:$8 sps:$4 sm:$0xff]  }
  0xaa   :  { %1177 = vmatprep.subr.bf16.mxu1 %v1591_v0 }
  0xab   :  { %1158 = vmatpush3.bf16.msra.mxu0 %v1270_v3  ;;  %v1298_v3 = vld [vmem:[%s1960_s6 + $0x44] ss:$8 sps:$4 sm:$0xff]  }
  0xac   :  { %1159 = vmatprep.subr.bf16.mxu0 %v1591_v0 }
  0xad   :  { %1178 = vmatpush3.bf16.msra.mxu1 %v1278_v13 }
  0xae   :  { %1179 = vmatprep.subr.bf16.mxu1 %v1591_v0 }
  0xaf   :  { %1160 = vmatpush3.bf16.msra.mxu0 %v1271_v4  ;;  %v1296_v4 = vld [vmem:[%s1960_s6 + $0x40] ss:$8 sps:$4 sm:$0xff]  }
  0xb0   :  { %1161 = vmatprep.subr.bf16.mxu0 %v1591_v0 }
  0xb1   :  { %1180 = vmatpush3.bf16.msra.mxu1 %v1279_v14 }
  0xb2   :  { %1181 = vmatprep.subr.bf16.mxu1 %v1591_v0 }
  0xb3   :  { %1162 = vmatpush3.bf16.msra.mxu0 %v1272_v5  ;;  %v1301_v5 = vld [vmem:[%s1960_s6 + $0x54] ss:$8 sps:$4 sm:$0xff]  }
  0xb4   :  { %1163 = vmatprep.subr.bf16.mxu0 %v1591_v0 }
  0xb5   :  { %1182 = vmatpush3.bf16.msra.mxu1 %v1280_v15 }
  0xb6   :  { %1183 = vmatprep.subr.bf16.mxu1 %v1591_v0 }
  0xb7   :  { %1164 = vmatpush3.bf16.msra.mxu0 %v1273_v6  ;;  %v1299_v6 = vld [vmem:[%s1960_s6 + $0x50] ss:$8 sps:$4 sm:$0xff]  }
  0xb8   :  { %1165 = vmatprep.subr.bf16.mxu0 %v1591_v0 }
  0xb9   :  { %1184 = vmatpush3.bf16.msra.mxu1 %v1281_v16 }
  0xba   :  { %1185 = vmatprep.subr.bf16.mxu1 %v1591_v0 }
  0xbb   :  { %1166 = vmatpush3.bf16.msra.mxu0 %v1274_v7  ;;  %v1304_v7 = vld [vmem:[%s1960_s6 + $0x64] ss:$8 sps:$4 sm:$0xff]  }
  0xbc   :  { %1167 = vmatprep.subr.bf16.mxu0 %v1591_v0 }
  0xbd   :  { %1186 = vmatpush3.bf16.msra.mxu1 %v1282_v17 }
  0xbe   :  { %1187 = vmatprep.subr.bf16.mxu1 %v1591_v0 }
  0xbf   :  { %1168 = vmatpush3.bf16.msra.mxu0 %v1275_v8  ;;  %v1302_v8 = vld [vmem:[%s1960_s6 + $0x60] ss:$8 sps:$4 sm:$0xff]  }
  0xc0   :  { %562 = vmatprep.subr.bf16.mxu0 %v1286_v58 }
  0xc1   :  { %1188 = vmatpush3.bf16.msra.mxu1 %v1283_v18 }
  0xc2   :  { %1170 = vmatmul.mubr.bf16.vlgmr.msra.gmra.mrb[0].mxu0 %v182_v10  ;;  %1193 = vmatprep.subr.bf16.mxu1 %v1591_v0  ;;  %v1307_v10 = vld [vmem:[%s1960_s6 + $0x74] ss:$8 sps:$4 sm:$0xff]  }
  0xc3   :  { %563 = vmatpush1.bf16.msra.mxu0 %v1284_v59  ;;  %594 = vmatprep.mubr.bf16.mxu0 %v1593_v11 }
  0xc4   :  { %564 = vmatprep.subr.bf16.mxu0 %v1289_v60 }
  0xc7   :  { %565 = vmatpush1.bf16.msra.mxu0 %v1287_v61 }
  0xc8   :  { %566 = vmatprep.subr.bf16.mxu0 %v1292_v62 }
  0xcb   :  { %567 = vmatpush1.bf16.msra.mxu0 %v1290_v63 }
  0xcc   :  { %568 = vmatprep.subr.bf16.mxu0 %v1295_v1 }
  0xcf   :  { %569 = vmatpush1.bf16.msra.mxu0 %v1293_v2 }
  0xd0   :  { %570 = vmatprep.subr.bf16.mxu0 %v1298_v3 }
  0xd3   :  { %571 = vmatpush1.bf16.msra.mxu0 %v1296_v4 }
  0xd4   :  { %572 = vmatprep.subr.bf16.mxu0 %v1301_v5 }
  0xd7   :  { %573 = vmatpush1.bf16.msra.mxu0 %v1299_v6 }
  0xd8   :  { %574 = vmatprep.subr.bf16.mxu0 %v1304_v7 }
  0xdb   :  { %575 = vmatpush1.bf16.msra.mxu0 %v1302_v8 }
  0xdc   :  { %576 = vmatprep.subr.bf16.mxu0 %v1307_v10 }
  0xdf   :  { %577 = vmatpush1.bf16.msra.mxu0 %v1305_v9 }
  0xe0   :  { %1213 = vmatprep.subr.bf16.mxu0 %v1591_v0 }
 0x195   :  { %v265_v19 = vpop.f32.mrb[0].mxu0 }
 0x196   :  { %v272_v20 = vrot.slane %v265_v19, 4  ;;  %v280_v21 = vmul.f32 %v265_v19, %v265_v19  ;;  %v1171_v22 = vpop.f32.mrb[1].mxu0 }
 0x197   :  { %v268_v23 = vpop.f32.mrb[2].mxu0 }
 0x198   :  { %v273_v24 = vadd.f32 %v272_v20, %v265_v19  ;;  %v281_v25 = vrot.slane %v280_v21, 4  ;;  %v1172_v26 = vpop.f32.mrb[3].mxu0 }
 0x19a   :  { %v274_v27 = vrot.slane %v273_v24, 2  ;;  %v282_v28 = vadd.f32 %v281_v25, %v280_v21 }
 0x19c   :  { %v275_v29 = vadd.f32 %v274_v27, %v273_v24  ;;  %v283_v30 = vrot.slane %v282_v28, 2 }
 0x19e   :  { %v276_v31 = vrot.slane %v275_v29, 1  ;;  %v284_v32 = vadd.f32 %v283_v30, %v282_v28 }
 0x1a0   :  { %v277_v33 = vadd.f32 %v276_v31, %v275_v29  ;;  %v285_v34 = vrot.slane %v284_v32, 1 }
 0x1a2   :  { %v279_v35 = vmul.f32 0.125, %v277_v33  ;;  %v286_v36 = vadd.f32 %v285_v34, %v284_v32 }
 0x1a4   :  { %v287_v37 = vmul.f32 0.125, %v286_v36  ;;  %v288_v38 = vmul.f32 %v279_v35, %v279_v35 }
 0x1a6   :  { %v289_v39 = vsub.f32 %v287_v37, %v288_v38 }
 0x1a8   :  { %v290_v40 = vmax.f32 %v289_v39, 0.0 }
 0x1aa   :  { %v291_v41 = vadd.f32 1e-05, %v290_v40 }
 0x1ac   :  { %1332 = vrsqrt.f32 %v291_v41 }
 0x1b6   :  { %v1333_v45 = vpop.eup %1332 }
 0x1b7   :  { %v293_v46 = vmul.f32 %v1333_v45, %v271_v44 }
 0x1b9   :  { %v294_v48 = vmul.f32 %v293_v46, %v279_v35  ;;  %v302_v49 = vrot.slane %v293_v46, %v1839_v47  ;;  %v415_v35 = vld [vmem:[%s1959_s5] sm:$0x3] }
 0x1bb   :  { %v296_v50 = vrot.slane %v294_v48, 7  ;;  %v303_v53 = vmul.f32 %v302_v49, %v265_v19  ;;  %v1308_v48 = vld [vmem:[#allocation8] sm:$0xff]   ;;  %v1309_v49 = vld [vmem:[#allocation8 + $0x8] sm:$0xff]  }
 0x1bd   :  { %v298_v52 = vsub.f32 %v271_v44, %v296_v50  ;;  %v1310_v50 = vld [vmem:[#allocation8 + $0x10] sm:$0xff]  }
 0x1bf   :  { %v307_v54 = vrot.slane %v298_v52, %v1842_v51  ;;  %v1311_v52 = vld [vmem:[#allocation8 + $0x18] sm:$0xff]  }
 0x1c1   :  { %v308_v55 = vadd.f32 %v307_v54, %v303_v53  ;;  %v1312_v53 = vld [vmem:[#allocation8 + $0x20] sm:$0xff]   ;;  %v1313_v54 = vld [vmem:[#allocation8 + $0x28] sm:$0xff]  }
 0x1c3   :  { %v309_v56 = vmax.f32 %v308_v55, 0.0  ;;  %v1314_v55 = vld [vmem:[#allocation8 + $0x30] sm:$0xff]  }
 0x1c5   :  { %v326_v57 = vpack.c.bf16 %v309_v56, %v309_v56  ;;  %v1315_v56 = vld [vmem:[#allocation8 + $0x38] sm:$0xff]  }
 0x1c7   :  { %1190 = vmatmul.mubr.bf16.vlgmr.msra.gmra.mrb[0].mxu1 %v326_v57  ;;  %v470_v57 = vld [vmem:[#allocation7] sm:$0x3] }
 0x1c8   :  { %1209 = vmatprep.mubr.msk.bf16.mxu1 %vm1592_vm0, %v1591_v0  ;;  %1194 = vmatpush3.bf16.msra.mxu1 %v1308_v48  ;;  %v475_v58 = vrot.slane %v470_v57, %v1839_v47  ;;  %v479_v59 = vrot.slane %v470_v57, %v1842_v51 }
 0x1c9   :  { %1195 = vmatprep.subr.bf16.mxu1 %v1591_v0 }
 0x1cc   :  { %1196 = vmatpush3.bf16.msra.mxu1 %v1309_v49 }
 0x1cd   :  { %1197 = vmatprep.subr.bf16.mxu1 %v1591_v0 }
 0x1d0   :  { %1198 = vmatpush3.bf16.msra.mxu1 %v1310_v50 }
 0x1d1   :  { %1199 = vmatprep.subr.bf16.mxu1 %v1591_v0 }
 0x1d4   :  { %1200 = vmatpush3.bf16.msra.mxu1 %v1311_v52  ;;  %v727_v52 = vld [vmem:[#allocation10] sm:$0x3] }
 0x1d5   :  { %1201 = vmatprep.subr.bf16.mxu1 %v1591_v0 }
 0x1d8   :  { %1202 = vmatpush3.bf16.msra.mxu1 %v1312_v53 }
 0x1d9   :  { %1203 = vmatprep.subr.bf16.mxu1 %v1591_v0 }
 0x1dc   :  { %1204 = vmatpush3.bf16.msra.mxu1 %v1313_v54 }
 0x1dd   :  { %1205 = vmatprep.subr.bf16.mxu1 %v1591_v0 }
 0x1e0   :  { %1206 = vmatpush3.bf16.msra.mxu1 %v1314_v55 }
 0x1e1   :  { %1207 = vmatprep.subr.bf16.mxu1 %v1591_v0 }
 0x1e4   :  { %1208 = vmatpush3.bf16.msra.mxu1 %v1315_v56 }
 0x1e5   :  { %1233 = vmatprep.subr.bf16.mxu1 %v1591_v0 }
 0x29a   :  { %v409_v12 = vpop.f32.mrb[0].mxu1 }
 0x29b   :  { %v416_v13 = vrot.slane %v409_v12, 4  ;;  %v423_v14 = vmul.f32 %v409_v12, %v409_v12  ;;  %v1191_v15 = vpop.f32.mrb[1].mxu1 }
 0x29c   :  { %v412_v16 = vpop.f32.mrb[2].mxu1 }
 0x29d   :  { %v417_v17 = vadd.f32 %v416_v13, %v409_v12  ;;  %v424_v18 = vrot.slane %v423_v14, 4  ;;  %v1192_v19 = vpop.f32.mrb[3].mxu1  ;;  %v617_v13 = vld [vmem:[%s1955_s1] sm:$0xff]  ;;  %s1594_s1 = smov [#allocation17]  }
 0x29e   :  { %v1316_v19 = vld [vmem:[#allocation11] sm:$0xff]  }
 0x29f   :  { %v418_v20 = vrot.slane %v417_v17, 2  ;;  %v425_v21 = vadd.f32 %v424_v18, %v423_v14 }
 0x2a1   :  { %v419_v22 = vadd.f32 %v418_v20, %v417_v17  ;;  %v426_v23 = vrot.slane %v425_v21, 2  ;;  %v1317_v20 = vld [vmem:[#allocation11 + $0x8] sm:$0xff]  }
 0x2a3   :  { %v420_v24 = vrot.slane %v419_v22, 1  ;;  %v427_v25 = vadd.f32 %v426_v23, %v425_v21  ;;  %v1318_v21 = vld [vmem:[#allocation11 + $0x10] sm:$0xff]   ;;  %v1320_v23 = vld [vmem:[#allocation11 + $0x20] sm:$0xff]  }
 0x2a5   :  { %v421_v26 = vadd.f32 %v420_v24, %v419_v22  ;;  %v428_v27 = vrot.slane %v427_v25, 1  ;;  %v1319_v22 = vld [vmem:[#allocation11 + $0x18] sm:$0xff]   ;;  %v1321_v24 = vld [vmem:[#allocation11 + $0x28] sm:$0xff]  }
 0x2a7   :  { %v422_v28 = vmul.f32 0.125, %v421_v26  ;;  %v429_v29 = vadd.f32 %v428_v27, %v427_v25  ;;  %v1322_v25 = vld [vmem:[#allocation11 + $0x30] sm:$0xff]   ;;  %v1323_v26 = vld [vmem:[#allocation11 + $0x38] sm:$0xff]  }
 0x2a9   :  { %v430_v30 = vmul.f32 0.125, %v429_v29  ;;  %v431_v31 = vmul.f32 %v422_v28, %v422_v28 }
 0x2ab   :  { %v432_v32 = vsub.f32 %v430_v30, %v431_v31 }
 0x2ad   :  { %v433_v33 = vmax.f32 %v432_v32, 0.0 }
 0x2af   :  { %v434_v34 = vadd.f32 1e-05, %v433_v33 }
 0x2b1   :  { %1334 = vrsqrt.f32 %v434_v34 }
 0x2bb   :  { %v1335_v36 = vpop.eup %1334 }
 0x2bc   :  { %v436_v37 = vmul.f32 %v1335_v36, %v415_v35 }
 0x2be   :  { %v437_v38 = vmul.f32 %v436_v37, %v422_v28  ;;  %v445_v40 = vrot.slane %v436_v37, %v1839_v47 }
 0x2c0   :  { %v439_v39 = vrot.slane %v437_v38, 7  ;;  %v446_v42 = vmul.f32 %v445_v40, %v409_v12 }
 0x2c2   :  { %v441_v41 = vsub.f32 %v415_v35, %v439_v39 }
 0x2c4   :  { %v450_v43 = vrot.slane %v441_v41, %v1842_v51 }
 0x2c6   :  { %v451_v44 = vadd.f32 %v450_v43, %v446_v42 }
 0x2c8   :  { %v452_v45 = vmax.f32 %v451_v44, 0.0 }
 0x2ca   :  { %v469_v46 = vpack.c.bf16 %v452_v45, %v452_v45 }
 0x2cc   :  { %595 = vmatmul.mubr.bf16.vlgmr.msra.gmra.mrb[4].mxu0 %v469_v46 }
 0x2cd   :  { %1229 = vmatprep.mubr.msk.bf16.mxu0 %vm1592_vm0, %v1591_v0  ;;  %1214 = vmatpush3.bf16.msra.mxu0 %v1316_v19 }
 0x2ce   :  { %1215 = vmatprep.subr.bf16.mxu0 %v1591_v0 }
 0x2d1   :  { %1216 = vmatpush3.bf16.msra.mxu0 %v1317_v20 }
 0x2d2   :  { %1217 = vmatprep.subr.bf16.mxu0 %v1591_v0 }
 0x2d5   :  { %1218 = vmatpush3.bf16.msra.mxu0 %v1318_v21 }
 0x2d6   :  { %1219 = vmatprep.subr.bf16.mxu0 %v1591_v0 }
 0x2d9   :  { %1220 = vmatpush3.bf16.msra.mxu0 %v1319_v22 }
 0x2da   :  { %1221 = vmatprep.subr.bf16.mxu0 %v1591_v0 }
 0x2dd   :  { %1222 = vmatpush3.bf16.msra.mxu0 %v1320_v23 }
 0x2de   :  { %1223 = vmatprep.subr.bf16.mxu0 %v1591_v0 }
 0x2e1   :  { %1224 = vmatpush3.bf16.msra.mxu0 %v1321_v24 }
 0x2e2   :  { %1225 = vmatprep.subr.bf16.mxu0 %v1591_v0 }
 0x2e5   :  { %1226 = vmatpush3.bf16.msra.mxu0 %v1322_v25 }
 0x2e6   :  { %1227 = vmatprep.subr.bf16.mxu0 %v1591_v0 }
 0x2e9   :  { %1228 = vmatpush3.bf16.msra.mxu0 %v1323_v26 }
 0x39f   :  { %v596_v60 = vpop.f32.mrb[4].mxu0 }
 0x3a0   :  { %v597_v61 = vadd.f32 %v596_v60, %v475_v58  ;;  %v598_v62 = vpop.f32.mrb[5].mxu0 }
 0x3a1   :  { %v599_v63 = vadd.f32 %v598_v62, %v479_v59  ;;  %v600_v1 = vpop.f32.mrb[6].mxu0 }
 0x3a2   :  { %620 = vst [vmem:[%s1969_s15] sm:$0xff] %v597_v61  ;;  %v601_v2 = vpop.f32.mrb[7].mxu0  ;;  %v1324_v1 = vld [vmem:[#allocation14] sm:$0xff]  }
 0x3a3   :  { %v604_v3 = vmin.f32 %v599_v63, 20.0  ;;  %vm603_vm2 = vcmp.gt.f32.partialorder %v599_v63, 20.0  ;;  %v1325_v2 = vld [vmem:[#allocation14 + $0x8] sm:$0xff]  }
 0x3a5   :  { %v605_v4 = vmul.f32 1.442695, %v604_v3  ;;  %v1326_v3 = vld [vmem:[#allocation14 + $0x10] sm:$0xff]  }
 0x3a7   :  { %1336 = vpow2.f32 %v605_v4  ;;  %v1327_v4 = vld [vmem:[#allocation14 + $0x18] sm:$0xff]  }
 0x3b1   :  { %v1337_v5 = vpop.eup %1336 }
 0x3b2   :  { %v607_v6 = vadd.f32 1.0, %v1337_v5  ;;  %v610_v7 = vmul.f32 -0.5, %v1337_v5  ;;  %v613_v9 = vand.u32 2147483647, %v1337_v5 }
 0x3b4   :  { %1338 = vlog2.f32 %v607_v6  ;;  %v611_v8 = vadd.f32 1.0, %v610_v7  ;;  %vm614_vm1 = vcmp.lt.f32.partialorder %v613_v9, 0.0004427343  ;;  %v1329_v6 = vld [vmem:[#allocation14 + $0x28] sm:$0xff]   ;;  %v1330_v7 = vld [vmem:[#allocation14 + $0x30] sm:$0xff]  }
 0x3b6   :  { %v612_v12 = vmul.f32 %v1337_v5, %v611_v8  ;;  %v1328_v5 = vld [vmem:[#allocation14 + $0x20] sm:$0xff]   ;;  %v1331_v8 = vld [vmem:[#allocation14 + $0x38] sm:$0xff]  }
 0x3be   :  { %v1339_v10 = vpop.eup %1338 }
 0x3bf   :  { %v609_v11 = vmul.f32 0.6931472, %v1339_v10 }
 0x3c1   :  { %v615_v14 = vsel %vm614_vm1, %v612_v12, %v609_v11 }
 0x3c2   :  { %v616_v15 = vsel %vm603_vm2, %v599_v63, %v615_v14 }
 0x3c3   :  { %v618_v16 = vmul.f32 %v617_v13, %v616_v15  ;;  %621 = vst [vmem:[%s1969_s15 + $0x8] sm:$0xff] %v616_v15  ;;  %s1033_s15 = sshll.u32 %s1594_s1, 4  ;;  %s1034_s15 = int_to_ptr.vmem [resolvable:$true] %s1033_s15 }
 0x3c4   :  { %s1546_s12 = scalar_lea.vmem %s1034_s15, 128  ;;  %p1551_p3 = scmp.lt.s32.totalorder %s1034_s15, %s1034_s15 }
 0x3c5   :  { %v619_v17 = vadd.f32 %v618_v16, %v597_v61  ;;  %p1547_p2 = scmp.ne.s32.totalorder %s1034_s15, %s1546_s12  ;;  %p1552_p4 = scmp.lt.s32.totalorder %s1546_s12, %s1546_s12 }
 0x3c7   :  { %v638_v18 = vpack.c.bf16 %v619_v17, %v619_v17  ;;  %p1553_p5 = por %p1552_p4, %p1551_p3 }
 0x3c9   :  { %1210 = vmatmul.mubr.bf16.vlgmr.msra.gmra.mrb[4].mxu1 %v638_v18  ;;  %p1554_p6 = pnand %p1553_p5, %p1547_p2 }
 0x3ca   :  { %1249 = vmatprep.mubr.msk.bf16.mxu1 %vm1592_vm0, %v1591_v0  ;;  %1234 = vmatpush3.bf16.msra.mxu1 %v1324_v1 }
 0x3cb   :  { %1235 = vmatprep.subr.bf16.mxu1 %v1591_v0 }
 0x3ce   :  { %1236 = vmatpush3.bf16.msra.mxu1 %v1325_v2 }
 0x3cf   :  { %1237 = vmatprep.subr.bf16.mxu1 %v1591_v0 }
 0x3d2   :  { %1238 = vmatpush3.bf16.msra.mxu1 %v1326_v3 }
 0x3d3   :  { %1239 = vmatprep.subr.bf16.mxu1 %v1591_v0 }
 0x3d6   :  { %1240 = vmatpush3.bf16.msra.mxu1 %v1327_v4 }
 0x3d7   :  { %1241 = vmatprep.subr.bf16.mxu1 %v1591_v0 }
 0x3da   :  { %1242 = vmatpush3.bf16.msra.mxu1 %v1328_v5 }
 0x3db   :  { %1243 = vmatprep.subr.bf16.mxu1 %v1591_v0 }
 0x3de   :  { %1244 = vmatpush3.bf16.msra.mxu1 %v1329_v6 }
 0x3df   :  { %1245 = vmatprep.subr.bf16.mxu1 %v1591_v0 }
 0x3e2   :  { %1246 = vmatpush3.bf16.msra.mxu1 %v1330_v7 }
 0x3e3   :  { %1247 = vmatprep.subr.bf16.mxu1 %v1591_v0 }
 0x3e6   :  { %1248 = vmatpush3.bf16.msra.mxu1 %v1331_v8 }
 0x49c   :  { %v721_v27 = vpop.f32.mrb[4].mxu1 }
 0x49d   :  { %v728_v28 = vrot.slane %v721_v27, 4  ;;  %v735_v29 = vmul.f32 %v721_v27, %v721_v27  ;;  %v1211_v30 = vpop.f32.mrb[5].mxu1 }
 0x49e   :  { %v724_v31 = vpop.f32.mrb[6].mxu1 }
 0x49f   :  { %v729_v32 = vadd.f32 %v728_v28, %v721_v27  ;;  %v736_v33 = vrot.slane %v735_v29, 4  ;;  %v1212_v34 = vpop.f32.mrb[7].mxu1  ;;  %v870_v31 = vld [vmem:[#allocation13] sm:$0x3] }
 0x4a1   :  { %v730_v35 = vrot.slane %v729_v32, 2  ;;  %v737_v36 = vadd.f32 %v736_v33, %v735_v29 }
 0x4a3   :  { %v731_v37 = vadd.f32 %v730_v35, %v729_v32  ;;  %v738_v38 = vrot.slane %v737_v36, 2 }
 0x4a5   :  { %v732_v39 = vrot.slane %v731_v37, 1  ;;  %v739_v40 = vadd.f32 %v738_v38, %v737_v36 }
 0x4a7   :  { %v733_v41 = vadd.f32 %v732_v39, %v731_v37  ;;  %v740_v42 = vrot.slane %v739_v40, 1 }
 0x4a9   :  { %v734_v43 = vmul.f32 0.125, %v733_v41  ;;  %v741_v44 = vadd.f32 %v740_v42, %v739_v40 }
 0x4ab   :  { %v742_v45 = vmul.f32 0.125, %v741_v44  ;;  %v743_v46 = vmul.f32 %v734_v43, %v734_v43 }
 0x4ad   :  { %v744_v48 = vsub.f32 %v742_v45, %v743_v46 }
 0x4af   :  { %v745_v49 = vmax.f32 %v744_v48, 0.0 }
 0x4b1   :  { %v746_v50 = vadd.f32 1e-05, %v745_v49 }
 0x4b3   :  { %1340 = vrsqrt.f32 %v746_v50 }
 0x4bd   :  { %v1341_v53 = vpop.eup %1340 }
 0x4be   :  { %v748_v54 = vmul.f32 %v1341_v53, %v727_v52 }
 0x4c0   :  { %v749_v55 = vmul.f32 %v748_v54, %v734_v43  ;;  %v757_v57 = vrot.slane %v748_v54, %v1839_v47  ;;  %v1098_v43 = vld [vmem:[#allocation16] ss:$0 sm:$0xff] }
 0x4c2   :  { %v751_v56 = vrot.slane %v749_v55, 7  ;;  %v758_v59 = vmul.f32 %v757_v57, %v721_v27 }
 0x4c4   :  { %v753_v58 = vsub.f32 %v727_v52, %v751_v56 }
 0x4c6   :  { %v762_v60 = vrot.slane %v753_v58, %v1842_v51 }
 0x4c8   :  { %v763_v61 = vadd.f32 %v762_v60, %v758_v59 }
 0x4ca   :  { %v764_v62 = vmax.f32 %v763_v61, 0.0 }
 0x4cc   :  { %v781_v63 = vpack.c.bf16 %v764_v62, %v764_v62 }
 0x4ce   :  { %1230 = vmatmul.mubr.bf16.vlgmr.msra.gmra.mrb[8].mxu0 %v781_v63 }
 0x5a1   :  { %v864_v9 = vpop.f32.mrb[8].mxu0 }
 0x5a2   :  { %v871_v10 = vrot.slane %v864_v9, 4  ;;  %v878_v11 = vmul.f32 %v864_v9, %v864_v9  ;;  %v1231_v12 = vpop.f32.mrb[9].mxu0 }
 0x5a3   :  { %v867_v13 = vpop.f32.mrb[10].mxu0 }
 0x5a4   :  { %v872_v14 = vadd.f32 %v871_v10, %v864_v9  ;;  %v879_v15 = vrot.slane %v878_v11, 4  ;;  %v1232_v16 = vpop.f32.mrb[11].mxu0 }
 0x5a6   :  { %v873_v17 = vrot.slane %v872_v14, 2  ;;  %v880_v18 = vadd.f32 %v879_v15, %v878_v11 }
 0x5a8   :  { %v874_v19 = vadd.f32 %v873_v17, %v872_v14  ;;  %v881_v20 = vrot.slane %v880_v18, 2 }
 0x5aa   :  { %v875_v21 = vrot.slane %v874_v19, 1  ;;  %v882_v22 = vadd.f32 %v881_v20, %v880_v18 }
 0x5ac   :  { %v876_v23 = vadd.f32 %v875_v21, %v874_v19  ;;  %v883_v24 = vrot.slane %v882_v22, 1 }
 0x5ae   :  { %v877_v25 = vmul.f32 0.125, %v876_v23  ;;  %v884_v0 = vadd.f32 %v883_v24, %v882_v22 }
 0x5b0   :  { %v885_v26 = vmul.f32 0.125, %v884_v0  ;;  %v886_v27 = vmul.f32 %v877_v25, %v877_v25 }
 0x5b2   :  { %v887_v28 = vsub.f32 %v885_v26, %v886_v27 }
 0x5b4   :  { %v888_v29 = vmax.f32 %v887_v28, 0.0 }
 0x5b6   :  { %v889_v30 = vadd.f32 1e-05, %v888_v29 }
 0x5b8   :  { %1342 = vrsqrt.f32 %v889_v30 }
 0x5c2   :  { %v1343_v32 = vpop.eup %1342 }
 0x5c3   :  { %v891_v33 = vmul.f32 %v1343_v32, %v870_v31 }
 0x5c5   :  { %v892_v34 = vmul.f32 %v891_v33, %v877_v25  ;;  %v900_v36 = vrot.slane %v891_v33, %v1839_v47 }
 0x5c7   :  { %v894_v35 = vrot.slane %v892_v34, 7  ;;  %v901_v38 = vmul.f32 %v900_v36, %v864_v9 }
 0x5c9   :  { %v896_v37 = vsub.f32 %v870_v31, %v894_v35 }
 0x5cb   :  { %v905_v39 = vrot.slane %v896_v37, %v1842_v51 }
 0x5cd   :  { %v906_v40 = vadd.f32 %v905_v39, %v901_v38 }
 0x5cf   :  { %v907_v41 = vmax.f32 %v906_v40, 0.0 }
 0x5d1   :  { %v924_v42 = vpack.c.bf16 %v907_v41, %v907_v41 }
 0x5d3   :  { %1250 = vmatmul.mubr.bf16.vlgmr.msra.gmra.mrb[8].mxu1 %v924_v42 }
 0x6a6   :  { %v1014_v44 = vpop.f32.mrb[8].mxu1 }
 0x6a7   :  { %v1015_v45 = vadd.f32 %v1098_v43, %v1014_v44  ;;  %v1251_v46 = vpop.f32.mrb[9].mxu1 }
 0x6a8   :  { %v1017_v48 = vpop.f32.mrb[10].mxu1 }
 0x6a9   :  { %v1107_v49 = vmul.f32 -1.442695, %v1015_v45  ;;  %v1252_v50 = vpop.f32.mrb[11].mxu1 }
 0x6ab   :  { %1344 = vpow2.f32 %v1107_v49 }
 0x6b5   :  { %v1345_v52 = vpop.eup %1344 }
 0x6b6   :  { %v1023_v53 = vadd.f32 1.0, %v1345_v52 }
 0x6b8   :  { %1346 = vrcp.f32 %v1023_v53 }
 0x6c2   :  { %v1347_v47 = vpop.eup %1346 }
 0x6c3   :  { %1026 = vst [vmem:[#allocation17] sm:$0xff] %v1347_v47 }
 0x6c4   :  { %1557 = shalt.err (!%p1554_p6)
}
 0x6c5   :  { %s1558_s26 = scalar_lea.hbm %s1968_s14, 128 }
 0x6c6   :  { %p1559_p7 = scmp.ne.s32.totalorder %s1968_s14, %s1558_s26  ;;  %p1562_p8 = scmp.lt.u32.totalorder %s1558_s26, %s1968_s14 }
 0x6c8   :  { %p1564_p9 = pnand %p1562_p8, %p1559_p7 }
 0x6ca   :  { %1567 = shalt.err (!%p1564_p9)
}
 0x6cb   :  { %1036 = dma.vmem_to_hbm [thread:$0]  %s1034_s15, 128, %s1968_s14, [#allocation4]  }
 0x6cc   :  { %1578 = dma.done.wait [#allocation4], 128  }
 0x6cd   :  { %1579 = vsyncadd [#allocation4], 4294967168 }
 0x6ce   :  { %1044 = vsyncpa [#allocation3], 1 }
 0x6cf   :  { %1045 = vsyncpa [#allocation6], 1 }
 0x6d0   :  { %1046 = vsyncpa [#allocation9], 1 }
 0x6d1   :  { %1047 = vsyncpa [#allocation12], 1 }
 0x6d2   :  { %1048 = vsyncpa [#allocation15], 1 }
 0x6d3   :  { %1049 = vsyncpa [#allocation4], 1 }

</bundles_post_ra>
